<compile_context>
chip_gen: v7x
topology: tpu7x:2x2x1
jax: 0.10.0
libtpu: 0.0.40
codegen_flags: <defaults>
</compile_context>

<pallas_src>
import functools

import jax
import jax.numpy as jnp
from jax import lax
from jax.experimental import pallas as pl
from jax.experimental.pallas import tpu as pltpu

NEG_INF = -1e30


def _masked_softmax(logits, mask):
    """Row-wise softmax over masked logits; mask > 0 marks existing edges."""
    valid = mask > 0
    e = jnp.where(valid, logits, NEG_INF)
    m = jnp.max(e, axis=-1, keepdims=True)
    p = jnp.where(valid, jnp.exp(e - m), 0.0)
    denom = jnp.sum(p, axis=-1, keepdims=True)          # >= 1 (self-loop always present)
    return p * pl.reciprocal(denom, approx=True)        # EUP slot, nearly free


def proj_kernel(x_ref, w_ref, h_ref):
    # Row tile of the layer-1 projection: h1 = x @ W1^T.
    h_ref[...] = jnp.dot(x_ref[...], w_ref[...], preferred_element_type=jnp.float32)


def gat1_kernel(adj_ref, h_all_ref, h_tile_ref, asrc_ref, adst_ref, hmask_ref,
                b1_ref, w2_ref, h2_ref, *, heads):
    mask = adj_ref[...]                                  # [TM, N]  dst rows x src cols
    h_all = h_all_ref[...]                               # [N, H*C] projected features (f32)

    # Attention-logit halves via MXU contractions over the feature axis.
    # a_src: head on sublanes, source node on lanes; a_dst: dst row on sublanes.
    # (No transposes needed anywhere.)
    a_src = lax.dot_general(asrc_ref[...], h_all, (((1,), (1,)), ((), ())),
                            preferred_element_type=jnp.float32)          # [H, N]
    a_dst = lax.dot_general(h_tile_ref[...], adst_ref[...], (((1,), (1,)), ((), ())),
                            preferred_element_type=jnp.float32)          # [TM, H]

    hmask = hmask_ref[...]                               # [H, H*C] one-hot column blocks
    agg = jnp.zeros((a_dst.shape[0], h_all.shape[1]), jnp.float32)       # [TM, H*C]
    for hh in range(heads):
        e = a_dst[:, hh:hh + 1] + a_src[hh:hh + 1, :]                    # [TM, N]
        e = jnp.where(e > 0, e, 0.2 * e)                                 # LeakyReLU(0.2)
        att = _masked_softmax(e, mask)                                   # [TM, N]
        # Columns outside this head's block are zeroed, so the full-width bf16 matmul
        # accumulates directly into the concat(head) layout (no narrow slices / concat).
        h_head = (h_all * hmask[hh:hh + 1, :]).astype(jnp.bfloat16)      # [N, H*C]
        agg = agg + jnp.dot(att.astype(jnp.bfloat16), h_head,
                            preferred_element_type=jnp.float32)

    o1 = agg + b1_ref[...]                                               # + bias1
    x2 = jnp.where(o1 > 0, o1, jnp.exp(jnp.minimum(o1, 0.0)) - 1.0)      # ELU
    # Fused layer-2 projection into a lane-dense, zero-padded 128-wide slab.
    h2_ref[...] = jnp.dot(x2, w2_ref[...], preferred_element_type=jnp.float32)


def gat2_kernel(adj_ref, h_all_ref, h_tile_ref, asrc_ref, adst_ref, b2_ref, o_ref):
    mask = adj_ref[...]                                  # [TM, N]
    h_all = h_all_ref[...]                               # [N, 128] padded layer-2 features
    a_src = lax.dot_general(asrc_ref[...], h_all, (((1,), (1,)), ((), ())),
                            preferred_element_type=jnp.float32)          # [1, N]
    a_dst = lax.dot_general(h_tile_ref[...], adst_ref[...], (((1,), (1,)), ((), ())),
                            preferred_element_type=jnp.float32)          # [TM, 1]
    e = a_dst + a_src
    e = jnp.where(e > 0, e, 0.2 * e)                                     # LeakyReLU(0.2)
    att = _masked_softmax(e, mask)                                       # [TM, N]
    out = jnp.dot(att.astype(jnp.bfloat16), h_all.astype(jnp.bfloat16),
                  preferred_element_type=jnp.float32)                    # [TM, 128]
    o_ref[...] = out + b2_ref[...]                                       # lane-dense store


def build_adjacency_mask(edge_index, num_nodes):
    """Dense {0,1} mask M[i, j] = 1 iff edge j -> i exists or i == j (PyG add_self_loops)."""
    src, dst = edge_index[0], edge_index[1]
    adj = jnp.zeros((num_nodes, num_nodes), jnp.float32)
    adj = adj.at[dst, src].set(1.0)                      # message flows src -> dst
    return jnp.maximum(adj, jnp.eye(num_nodes, dtype=jnp.float32))


def gat_forward(x, edge_index, params, *, heads=8, head_dim=8, tile_rows=8):
    (lin1_w, att_src1, att_dst1, bias1,
     lin2_w, att_src2, att_dst2, bias2) = params
    n, nfeat = x.shape
    hid = heads * head_dim
    nclass = lin2_w.shape[0]
    assert n % tile_rows == 0 and tile_rows % 8 == 0
    grid = (n // tile_rows,)
    cpad = 128                                           # lane-dense output padding

    adj = build_adjacency_mask(edge_index, n)
    w1_t = lin1_w.T                                      # [nfeat, hid]

    # Per-head attention vectors as [H, hid] contraction matrices (row h holds att[h] in
    # head-h's column block, zeros elsewhere) + matching one-hot head column mask.
    eye_h = jnp.eye(heads, dtype=jnp.float32)
    asrc_mat = (eye_h[:, :, None] * att_src1[None]).reshape(heads, hid)
    adst_mat = (eye_h[:, :, None] * att_dst1[None]).reshape(heads, hid)
    head_mask = jnp.repeat(eye_h, head_dim, axis=1)      # [H, hid]
    b1_row = bias1.reshape(1, hid)

    # Layer-2 parameters zero-padded to 128 lanes.
    w2_pad = jnp.zeros((hid, cpad), jnp.float32).at[:, :nclass].set(lin2_w.T)
    asrc2 = jnp.zeros((1, cpad), jnp.float32).at[0, :nclass].set(att_src2)
    adst2 = jnp.zeros((1, cpad), jnp.float32).at[0, :nclass].set(att_dst2)
    b2_row = jnp.zeros((1, cpad), jnp.float32).at[0, :nclass].set(bias2)

    parallel = pltpu.CompilerParams(dimension_semantics=("parallel",))

    def row_tile(c):
        return pl.BlockSpec((tile_rows, c), lambda i: (i, 0))

    def full(r, c):
        return pl.BlockSpec((r, c), lambda i: (0, 0))

    # K1: layer-1 projection (row-tiled).
    h1 = pl.pallas_call(
        proj_kernel,
        out_shape=jax.ShapeDtypeStruct((n, hid), jnp.float32),
        grid=grid,
        in_specs=[row_tile(nfeat), full(nfeat, hid)],
        out_specs=row_tile(hid),
        compiler_params=parallel,
    )(x, w1_t)

    # K2: layer-1 attention + aggregation + bias + ELU, fused layer-2 projection.
    h2 = pl.pallas_call(
        functools.partial(gat1_kernel, heads=heads),
        out_shape=jax.ShapeDtypeStruct((n, cpad), jnp.float32),
        grid=grid,
        in_specs=[row_tile(n), full(n, hid), row_tile(hid),
                  full(heads, hid), full(heads, hid), full(heads, hid),
                  full(1, hid), full(hid, cpad)],
        out_specs=row_tile(cpad),
        compiler_params=parallel,
    )(adj, h1, h1, asrc_mat, adst_mat, head_mask, b1_row, w2_pad)

    # K3: layer-2 (single-head) attention + aggregation + bias.
    out_pad = pl.pallas_call(
        gat2_kernel,
        out_shape=jax.ShapeDtypeStruct((n, cpad), jnp.float32),
        grid=grid,
        in_specs=[row_tile(n), full(n, cpad), row_tile(cpad),
                  full(1, cpad), full(1, cpad), full(1, cpad)],
        out_specs=row_tile(cpad),
        compiler_params=parallel,
    )(adj, h2, h2, asrc2, adst2, b2_row)

    # TODO(synk): for very large N, the per-row softmax would need a flash-style streamed
    # (online-softmax) formulation over source-column tiles instead of a full [TM, N] slab.
    return out_pad[:, :nclass]


def gat_reference(x, adj, params, *, heads=8, head_dim=8):
    """Pure-JAX f32 dense reference with PyG GATConv semantics."""
    (lin1_w, att_src1, att_dst1, bias1,
     lin2_w, att_src2, att_dst2, bias2) = params
    n = x.shape[0]
    h1 = x @ lin1_w.T
    h1h = h1.reshape(n, heads, head_dim)
    a_src = jnp.einsum("nhc,hc->nh", h1h, att_src1)
    a_dst = jnp.einsum("nhc,hc->nh", h1h, att_dst1)
    outs = []
    for hh in range(heads):
        e = a_dst[:, hh][:, None] + a_src[:, hh][None, :]
        e = jnp.where(e > 0, e, 0.2 * e)
        e = jnp.where(adj > 0, e, -jnp.inf)
        att = jax.nn.softmax(e, axis=-1)
        outs.append(att @ h1h[:, hh, :])
    o1 = jnp.concatenate(outs, axis=-1) + bias1[None, :]
    x2 = jnp.where(o1 > 0, o1, jnp.exp(jnp.minimum(o1, 0.0)) - 1.0)      # ELU
    h2 = x2 @ lin2_w.T
    a_src2 = h2 @ att_src2
    a_dst2 = h2 @ att_dst2
    e = a_dst2[:, None] + a_src2[None, :]
    e = jnp.where(e > 0, e, 0.2 * e)
    e = jnp.where(adj > 0, e, -jnp.inf)
    att = jax.nn.softmax(e, axis=-1)
    return att @ h2 + bias2[None, :]


if __name__ == "__main__":
    key = jax.random.PRNGKey(0)
    ks = jax.random.split(key, 9)

    N, NFEAT, NCLASS = 16, 32, 8
    HEADS, HEAD_DIM = 8, 8
    HID = HEADS * HEAD_DIM

    x = jax.random.normal(ks[0], (N, NFEAT), dtype=jnp.float32)

    # Undirected ring graph, edge_index = [2, E] (row 0 = src, row 1 = dst).
    src = jnp.arange(N, dtype=jnp.int32)
    dst = (src + 1) % N
    edge_index = jnp.stack(
        [jnp.concatenate([src, dst]), jnp.concatenate([dst, src])], axis=0)

    def glorot(k, shape, fan_in, fan_out):
        a = (6.0 / (fan_in + fan_out)) ** 0.5
        return jax.random.uniform(k, shape, jnp.float32, -a, a)

    params = (
        glorot(ks[1], (HID, NFEAT), NFEAT, HID),          # lin1 weight   [64, nfeat]
        glorot(ks[2], (HEADS, HEAD_DIM), HEAD_DIM, 1),    # att_src layer1 [8, 8]
        glorot(ks[3], (HEADS, HEAD_DIM), HEAD_DIM, 1),    # att_dst layer1 [8, 8]
        jax.random.uniform(ks[4], (HID,), jnp.float32, -0.1, 0.1),        # bias1
        glorot(ks[5], (NCLASS, HID), HID, NCLASS),        # lin2 weight   [nclass, 64]
        glorot(ks[6], (NCLASS,), NCLASS, 1),              # att_src layer2
        glorot(ks[7], (NCLASS,), NCLASS, 1),              # att_dst layer2
        jax.random.uniform(ks[8], (NCLASS,), jnp.float32, -0.1, 0.1),     # bias2
    )

    out = gat_forward(x, edge_index, params, heads=HEADS, head_dim=HEAD_DIM, tile_rows=8)
    out = jax.block_until_ready(out)

    adj = build_adjacency_mask(edge_index, N)
    ref = gat_reference(x, adj, params, heads=HEADS, head_dim=HEAD_DIM)

    assert out.shape == (N, NCLASS)
    # bf16 MXU aggregation + approx reciprocal => relaxed tolerance vs the f32 reference.
    assert jnp.allclose(out, ref, atol=3e-2, rtol=3e-2), float(jnp.max(jnp.abs(out - ref)))

    print("KERNEL_OK")
</pallas_src>

<mosaic_0001>
module attributes {stable_mosaic.version = 11 : i64} {
  func.func @proj_kernel(%arg0: i32, %arg1: memref<8x32xf32, #tpu.memory_space<vmem>>, %arg2: memref<32x64xf32, #tpu.memory_space<vmem>>, %arg3: memref<8x64xf32, #tpu.memory_space<vmem>>) attributes {dimension_semantics = [#tpu.dimension_semantics<parallel>], iteration_bounds = array<i64: 2>, scalar_prefetch = 0 : i64, scratch_operands = 0 : i64, tpu.core_type = #tpu.core_type<tc>, window_params = [{transform_indices = @transform_0, window_bounds = array<i64: 8, 32>}, {pipeline_mode = #tpu.pipeline_mode<synchronous>, transform_indices = @transform_1, window_bounds = array<i64: 32, 64>}, {transform_indices = @transform_2, window_bounds = array<i64: 8, 64>}]} {
    %c0 = arith.constant 0 : index
    %c0_0 = arith.constant 0 : index
    %0 = vector.load %arg1[%c0, %c0_0] : memref<8x32xf32, #tpu.memory_space<vmem>>, vector<8x32xf32>
    %c0_1 = arith.constant 0 : index
    %c0_2 = arith.constant 0 : index
    %1 = vector.load %arg2[%c0_1, %c0_2] : memref<32x64xf32, #tpu.memory_space<vmem>>, vector<32x64xf32>
    %cst = arith.constant dense<0.000000e+00> : vector<8x64xf32>
    %2 = tpu.matmul %0, %1, %cst {dimension_numbers = #tpu.dot_dimension_numbers<[1], [0], [0], [1], [0, 0, 1, 1], [], []>} : vector<8x32xf32>, vector<32x64xf32>, vector<8x64xf32> -> vector<8x64xf32>
    %c0_3 = arith.constant 0 : index
    %c0_4 = arith.constant 0 : index
    %3 = vector.load %arg3[%c0_3, %c0_4] : memref<8x64xf32, #tpu.memory_space<vmem>>, vector<8x64xf32>
    tpu.vector_store %arg3[%c0_3, %c0_4], %2 {strides = array<i32>} : memref<8x64xf32, #tpu.memory_space<vmem>>, vector<8x64xf32>,
    return
  }
  func.func @transform_0(%arg0: i32) -> (i32, i32) {
    %c0_i32 = arith.constant 0 : i32
    %c0_i32_0 = arith.constant 0 : i32
    return %arg0, %c0_i32 : i32, i32
  }
  func.func @transform_1(%arg0: i32) -> (i32, i32) {
    %c0_i32 = arith.constant 0 : i32
    %c0_i32_0 = arith.constant 0 : i32
    %c0_i32_1 = arith.constant 0 : i32
    return %c0_i32, %c0_i32_0 : i32, i32
  }
  func.func @transform_2(%arg0: i32) -> (i32, i32) {
    %c0_i32 = arith.constant 0 : i32
    %c0_i32_0 = arith.constant 0 : i32
    return %arg0, %c0_i32 : i32, i32
  }
}

</mosaic_0001>

<bundles_post_ra>
// kernel: tpu_custom_call.1
= control target key start
LH: loop header
LB: loop body
LE: loop exit
PB: predicated region body
PF: predicated region fallthrough
CT: control target
= control target key end

     0   :  { %7 = vsyncpa [#allocation3], 0  ;;  %s797_s0 = inlined_call_operand.hbm [shape: f32[16,32], index: 0, kind: input, shape index: {}]   ;;  %s798_s1 = inlined_call_operand.hbm [shape: f32[32,64], index: 1, kind: input, shape index: {}]   ;;  %s799_s2 = inlined_call_operand.hbm [shape: f32[16,64], index: 2, kind: output, shape index: {}]  }
   0x1   :  { %9 = vsyncpa [#allocation3 + $0x1], 0 }
   0x2   :  { %10 = vsyncpa [#allocation6], 0 }
   0x3   :  { %11 = vsyncpa [#allocation4], 0 }
   0x4   :  { %13 = vsyncpa [#allocation4 + $0x1], 0  ;;  %s601_s9 = smov 0   ;;  %s603_s10 = smov 0  }
   0x5   :  { %s605_s11 = smov 0   ;;  %s607_s12 = smov 0  }
   0x6 LB: > { %s622_s13 = sadd.s32 4294967295, %s576_s12   ;;  %s349_s14 = sadd.s32 4294967294, %s576_s12   ;;  %s576_s12 = sphi %s607_s12, %s819_s12   ;;  %s572_s11 = sphi %s605_s11, %s818_s11   ;;  %s568_s10 = sphi %s603_s10, %s817_s10   ;;  %s564_s9 = sphi %s601_s9, %s816_s9  }
   0x7   : > { %p39_p0 = scmp.ne.s32.totalorder %s568_s10, %s564_s9  ;;  %p800_p1 = scmp.eq.s32.totalorder %s622_s13, 0 }
   0x8   : > { %p90_p3 = scmp.eq.s32.totalorder %s349_s14, 1  ;;  %p350_p5 = scmp.ge.s32.totalorder %s576_s12, 1 }
   0x9   : > { %p631_p4 = por %p800_p1, %p39_p0  ;;  %p97_p7 = scmp.lt.s32.totalorder %s576_s12, 3 }
   0xa   : > { %p636_p6 = por %p90_p3, %p39_p0  ;;  %s578_s18 = smov [#allocation5]  }
   0xb   : > { %s803_s15 = scalar_select %p631_p4, 1, 0 }
   0xc   : > { %s804_s16 = scalar_select %p636_p6, 1, 0 }
   0xd   : > { %p641_p8 = pnand %p350_p5, %p97_p7  ;;  %s109_s19 = sshll.u32 %s578_s18, 4  ;;  %s645_s19 = int_to_ptr.vmem [resolvable:$true] %s109_s19 }
   0xe   : > { %s657_s21 = sadd.s32 1, %s576_s12   ;;  %s26_s22 = sadd.s32 1, %s572_s11 }
   0xf   : > { %s805_s17 = scalar_select %p641_p8, 1, 0 }
  0x10   : > { %p394_p9 = pneg %p641_p8  ;;  %s23_s23 = ssub.s32 %s576_s12, %s657_s21 }
  0x11   : > { %s448_s26 = scalar_lea.hbm %s798_s1, 512 }
  0x12   : > { %p652_p11 = pnand %p394_p9, %p800_p1  ;;  %p449_p12 = scmp.ne.s32.totalorder %s798_s1, %s448_s26 }
  0x13   : > { %p455_p5 = scmp.lt.u32.totalorder %s448_s26, %s798_s1 }
  0x14   : > { %p450_p13 = pneg %p652_p11 }
  0x16   : > { %p451_p0 = pnand %p450_p13, %p449_p12 }
  0x18   : > { %p452_p3 = pneg %p451_p0 }
  0x1a   : > { %p457_p7 = pnand %p455_p5, %p452_p3 }
  0x1c   : > { %460 = shalt.err (!%p457_p7)
}
  0x1d   : > { %s461_s3 = scalar_lea.vmem %s645_s19, 512  ;;  %p469_p2 = scmp.lt.s32.totalorder %s645_s19, %s645_s19 }
  0x1e   : > { %p462_p9 = scmp.ne.s32.totalorder %s645_s19, %s461_s3  ;;  %p470_p6 = scmp.lt.s32.totalorder %s461_s3, %s461_s3 }
  0x20   : > { %p464_p10 = pnand %p462_p9, %p450_p13  ;;  %p471_p4 = por %p470_p6, %p469_p2 }
  0x22   : > { %p465_p1 = pneg %p464_p10 }
  0x24   : > { %p472_p8 = pnand %p471_p4, %p465_p1 }
  0x26   : > { %475 = shalt.err (!%p472_p8)
}
  0x27   : > { %s579_s4 = smov 128   ;;  %s580_s5 = smov 8  }
  0x28   : > { %397 = dma.hbm_to_vmem [thread:$0]  (!%p652_p11), %s798_s1, 512, %s645_s19, [#allocation6], %s579_s4, %s579_s4, %s580_s5  }
  0x29   : > { %p24_p2 = scmp.eq.s32.totalorder %s23_s23, 0  ;;  %p33_p1 = scmp.ne.s32.totalorder %s572_s11, %s568_s10 }
  0x2a   : > { %p34_p4 = scmp.eq.s32.totalorder %s576_s12, 0  ;;  %p407_p6 = scmp.lt.s32.totalorder %s576_s12, 2 }
  0x2b   : > { %s688_s8 = scalar_select %p24_p2, %s572_s11, %s26_s22  }
  0x2c   : > { %p35_p8 = por %p34_p4, %p33_p1  ;;  %p807_p10 = scmp.eq.s32.totalorder %s622_s13, 1 }
  0x2d   : > { %s123_s18 = sand.u32 1, %s572_s11   ;;  %s354_s24 = sshll.u32 %s576_s12, 7 }
  0x2e   : > { %p692_p12 = por %p807_p10, %p33_p1  ;;  %s353_s25 = sshll.u32 %s123_s18, 3 }
  0x2f   : > { %s701_s27 = scalar_lea.hbm %s797_s0, %s354_s24  ;;  %s127_s19 = scalar_lea.vmem [#allocation2], %s353_s25 }
  0x30   : > { %s134_s22 = sshll.u32 %s127_s19, 4  ;;  %p703_p11 = pnand %p407_p6, %p35_p8  ;;  %s707_s22 = int_to_ptr.vmem [resolvable:$true] %s134_s22 }
  0x31   : > { %s124_s28 = scalar_lea.sflag [#allocation3], %s123_s18  ;;  %s476_s29 = scalar_lea.hbm %s701_s27, 128 }
  0x32   : > { %p477_p13 = scmp.ne.s32.totalorder %s701_s27, %s476_s29  ;;  %p478_p0 = pneg %p703_p11 }
  0x33   : > { %s481_s4 = scalar_lea.hbm %s797_s0, 256  ;;  %p482_p7 = scmp.lt.u32.totalorder %s701_s27, %s797_s0 }
  0x34   : > { %p479_p3 = pnand %p478_p0, %p477_p13  ;;  %p483_p9 = scmp.lt.u32.totalorder %s481_s4, %s476_s29 }
  0x35   : > { %p485_p1 = scmp.lt.u32.totalorder %s476_s29, %s701_s27 }
  0x36   : > { %p480_p5 = pneg %p479_p3  ;;  %p484_p2 = por %p483_p9, %p482_p7 }
  0x38   : > { %p486_p4 = por %p485_p1, %p484_p2 }
  0x3a   : > { %p487_p6 = pnand %p486_p4, %p480_p5 }
  0x3c   : > { %490 = shalt.err (!%p487_p6)
}
  0x3d   : > { %s491_s7 = scalar_lea.vmem %s707_s22, 128  ;;  %s581_s18 = smov [#allocation2]  }
  0x3e   : > { %p492_p8 = scmp.ne.s32.totalorder %s707_s22, %s491_s7  ;;  %s496_s24 = sshll.u32 %s581_s18, 4  ;;  %s497_s24 = int_to_ptr.vmem [resolvable:$false] %s496_s24 }
  0x3f   : > { %s498_s25 = scalar_lea.vmem %s497_s24, 256  ;;  %p499_p3 = scmp.lt.s32.totalorder %s707_s22, %s497_s24 }
  0x40   : > { %p494_p10 = pnand %p492_p8, %p478_p0  ;;  %p500_p7 = scmp.lt.s32.totalorder %s498_s25, %s491_s7 }
  0x42   : > { %p495_p13 = pneg %p494_p10  ;;  %p501_p9 = por %p500_p7, %p499_p3 }
  0x44   : > { %p502_p2 = pnand %p501_p9, %p495_p13 }
  0x46   : > { %505 = shalt.err (!%p502_p2)
}
  0x47   : > { %401 = dma.hbm_to_vmem [thread:$0]  (!%p703_p11), %s701_s27, 128, %s707_s22, %s124_s28  }
  0x48   : > { %p810_p5 = scmp.ne.s32.totalorder %s805_s17, 0 }
  0x49   : > { %s737_s20 = sand.u32 (!%p810_p5), 1, %s568_s10   ;;  %p811_p0 = scmp.ne.s32.totalorder (!%p810_p5), %s803_s15, 0 }
  0x4a   : > { %143 = sbr.rel (%p810_p5) target bundleno = 321 (0x141), region = 28  ;;  %s356_s26 = sshll.u32 (!%p810_p5), %s737_s20, 3 }
  0x4b   : > { %s146_s19 = scalar_lea.sflag (!%p810_p5), [#allocation3], %s737_s20  ;;  %s149_s29 = scalar_lea.vmem (!%p810_p5), [#allocation2], %s356_s26 }
  0x51   : > { %551 = dma.done.wait (%p811_p0), %s146_s19, 128  }
  0x52   : > { %553 = vsyncadd (%p811_p0), %s146_s19, 4294967168  ;;  %p812_p1 = scmp.eq.s32.totalorder %s622_s13, 0 }
  0x54   : > { %555 = dma.done.wait (%p812_p1), [#allocation6], 512   ;;  %p813_p11 = pmov %p812_p1 }
  0x55   : > { %v582_v0 = vmov 0.0|0.0   ;;  %vm583_vm0 = vmmov 0   ;;  %v584_v1 = vmov 0.0   ;;  %v175_v2 = vld [vmem:[#allocation5] sm:$0xff]  ;;  %v176_v3 = vld [vmem:[#allocation5 + $0x8] sm:$0xff]  ;;  %v177_v4 = vld [vmem:[#allocation5 + $0x10] sm:$0xff] }
  0x56   : > { %557 = vsyncadd (%p813_p11), [#allocation6], 4294966784  ;;  %380 = vmatprep.subr.bf16.mxu0 %v582_v0  ;;  %377 = vmatprep.mubr.msk.f32.mxu0 %vm583_vm0, %v584_v1  ;;  %v381_v5 = vpack.c.bf16 %v176_v3, %v175_v2  ;;  %v178_v6 = vld [vmem:[#allocation5 + $0x18] sm:$0xff]  ;;  %vm179_vm1 = vcmask 261120   ;;  %s361_s15 = sshll.u32 %s622_s13, 7  ;;  %s173_s17 = scalar_lea.vmem [#allocation7], %s356_s26 }
  0x57   : > { %v384_v7 = vpack.c.bf16 %v178_v6, %v177_v4  ;;  %v174_v8 = vld [vmem:[%s149_s29] sm:$0xff]  ;;  %s269_s27 = sshll.u32 %s173_s17, 4  ;;  %vm253_vm2 = vcmask 523264   ;;  %s753_s28 = scalar_lea.hbm %s799_s2, %s361_s15  ;;  %s755_s27 = int_to_ptr.vmem [resolvable:$true] %s269_s27 }
  0x58   : > { %382 = vmatpush3.bf16.msra.mxu0 %v381_v5  ;;  %s256_s30 = scalar_lea.sflag [#allocation4], %s737_s20  ;;  %s506_s3 = scalar_lea.vmem %s755_s27, 128 }
  0x59   : > { %383 = vmatprep.subr.bf16.mxu0 %v582_v0  ;;  %p507_p4 = scmp.ne.s32.totalorder %s755_s27, %s506_s3  ;;  %s585_s13 = smov [#allocation7]  }
  0x5a   : > { %s510_s4 = sshll.u32 %s585_s13, 4  ;;  %s511_s4 = int_to_ptr.vmem [resolvable:$false] %s510_s4 }
  0x5b   : > { %p508_p6 = pnand %p507_p4, %p692_p12  ;;  %s512_s5 = scalar_lea.vmem %s511_s4, 256 }
  0x5c   : > { %385 = vmatpush3.bf16.msra.mxu0 %v384_v7  ;;  %p513_p10 = scmp.lt.s32.totalorder %s755_s27, %s511_s4  ;;  %p514_p13 = scmp.lt.s32.totalorder %s512_s5, %s506_s3 }
  0x5d   : > { %p509_p8 = pneg %p508_p6 }
  0x5e   : > { %p515_p3 = por %p514_p13, %p513_p10 }
  0x5f   : > { %378 = vmatmul.mubr.msk.f32.vlgmr.msra.gmra.mrb[0].mxu0 %vm179_vm1, %v174_v8 }
  0x60   : > { %p516_p7 = pnand %p515_p3, %p509_p8 }
 0x132   : > { %v249_v9 = vpop.f32.mrb[0].mxu0 }
 0x133   : > { %254 = vst.msk [vmem:[%s173_s17] sm:$0xff] %vm253_vm2, %v249_v9  ;;  %v379_v10 = vpop.f32.mrb[1].mxu0 }
 0x134   : > { %519 = shalt.err (!%p516_p7)
}
 0x135   : > { %s520_s6 = scalar_lea.hbm %s753_s28, 128  ;;  %s524_s24 = scalar_lea.hbm %s799_s2, 256 }
 0x136   : > { %p521_p9 = scmp.ne.s32.totalorder %s753_s28, %s520_s6  ;;  %p525_p0 = scmp.lt.u32.totalorder %s753_s28, %s799_s2 }
 0x137   : > { %p526_p1 = scmp.lt.u32.totalorder %s524_s24, %s520_s6  ;;  %p528_p4 = scmp.lt.u32.totalorder %s520_s6, %s753_s28 }
 0x138   : > { %p522_p2 = pnand %p521_p9, %p692_p12 }
 0x139   : > { %p527_p11 = por %p526_p1, %p525_p0 }
 0x13a   : > { %p523_p5 = pneg %p522_p2 }
 0x13b   : > { %p529_p6 = por %p528_p4, %p527_p11 }
 0x13d   : > { %p530_p8 = pnand %p529_p6, %p523_p5 }
 0x13f   : > { %533 = shalt.err (!%p530_p8)
}
 0x140   : > { %392 = dma.vmem_to_hbm [thread:$0]  (%p692_p12), %s755_s27, 128, %s753_s28, %s256_s30  }
 0x141 PF: > { %s281_s26 = sand.u32 1, %s564_s9   ;;  %p814_p10 = scmp.ne.s32.totalorder %s804_s16, 0 }
 0x142   : > { %p815_p13 = scmp.ge.s32.totalorder %s576_s12, 2  ;;  %s282_s19 = scalar_lea.sflag [#allocation4], %s281_s26 }
 0x144   : > { %p403_p3 = pnand %p815_p13, %p814_p10 }
 0x146   : > { %559 = dma.done.wait (!%p403_p3), %s282_s19, 128  }
 0x147   : > { %561 = vsyncadd (!%p403_p3), %s282_s19, 4294967168  ;;  %p16_p7 = scmp.ge.s32.totalorder %s657_s21, 4   ;;  %s816_s9 = smov %s568_s10 }
 0x148   : > { %s817_s10 = smov %s572_s11  ;;  %s818_s11 = smov %s688_s8 }
 0x149   : > { %s819_s12 = smov %s657_s21  ;;  %18 = sbr.rel (!%p16_p7) target bundleno = 6 (0x6), region = 77 }
 0x150   :  { %287 = vsyncpa [#allocation3], 1 }
 0x151   :  { %289 = vsyncpa [#allocation3 + $0x1], 1 }
 0x152   :  { %290 = vsyncpa [#allocation6], 1 }
 0x153   :  { %291 = vsyncpa [#allocation4], 1 }
 0x154   :  { %293 = vsyncpa [#allocation4 + $0x1], 1 }

</bundles_post_ra>
